<compile_context>
chip_gen: v6e
topology: v6e:2x2x1
jax: 0.10.0
libtpu: 0.0.40
codegen_flags: <defaults>
</compile_context>

<pallas_src>
import functools

import jax
import jax.numpy as jnp
from jax.experimental import pallas as pl
from jax.experimental.pallas import tpu as pltpu

DDPG_EPS = 0.003


def _round_up(n: int, m: int) -> int:
    return ((n + m - 1) // m) * m


def actor_kernel(x_ref, w1_ref, b1_ref, w2_ref, b2_ref, out_ref, *,
                 action_lim, action_dim):
    # Layer 1: Linear(state -> hidden) + ReLU. Cast activations to the weight dtype
    # (bf16 by default) right before the MXU; accumulate in f32.
    x = x_ref[...].astype(w1_ref.dtype)
    h = jnp.dot(x, w1_ref[...], preferred_element_type=jnp.float32)
    h = jnp.maximum(h + b1_ref[...], 0.0)
    # Layer 2: Linear(hidden -> action) + Tanh, scaled to [-action_lim, action_lim].
    y = jnp.dot(h.astype(w2_ref.dtype), w2_ref[...], preferred_element_type=jnp.float32)
    act = jnp.tanh(y + b2_ref[...]) * action_lim
    # Store only the real action lanes (masked narrow store beats 32x extra HBM bytes).
    out_ref[...] = act[:, :action_dim].astype(out_ref.dtype)


def prepare_params(params, compute_dtype=jnp.bfloat16):
    """One-time prep: pad hidden/action dims to 128 multiples (exact through
    Linear/ReLU/Tanh) and cast weights to the MXU compute dtype. Call once, reuse."""
    w1, b1, w2, b2 = params["w1"], params["b1"], params["w2"], params["b2"]
    S, H = w1.shape
    A = w2.shape[1]
    H_pad = _round_up(H, 128)
    A_pad = _round_up(A, 128)
    return {
        "w1": jnp.pad(w1, ((0, 0), (0, H_pad - H))).astype(compute_dtype),
        "b1": jnp.pad(b1, ((0, 0), (0, H_pad - H))).astype(jnp.float32),
        "w2": jnp.pad(w2, ((0, H_pad - H), (0, A_pad - A))).astype(compute_dtype),
        "b2": jnp.pad(b2, ((0, 0), (0, A_pad - A))).astype(jnp.float32),
        "action_dim": int(A),
    }


def actor_ddpg_forward(state, prepped, action_lim, *, batch_tile=1024):
    """state: (B, state_dim) f32 (unpadded).  prepped: output of prepare_params."""
    w1_p, b1_p, w2_p, b2_p = prepped["w1"], prepped["b1"], prepped["w2"], prepped["b2"]
    A = prepped["action_dim"]
    B, S = state.shape
    assert w1_p.shape[0] == S, "state_dim mismatch with prepared params"
    H_pad = w1_p.shape[1]
    A_pad = w2_p.shape[1]

    # Batch tiling: single full-extent tile for small batches (the RL hot path);
    # otherwise split into >=2 balanced, 8-aligned tiles (keeps both v7x TCs busy).
    if B <= batch_tile:
        tb = B
        grid_n = 1
    else:
        n_tiles = max(2, pl.cdiv(B, batch_tile))
        tb = _round_up(pl.cdiv(B, n_tiles), 8)
        grid_n = pl.cdiv(B, tb)
    B_pad = tb * grid_n
    x = state if B_pad == B else jnp.pad(state, ((0, B_pad - B), (0, 0)))

    kernel = functools.partial(actor_kernel, action_lim=float(action_lim), action_dim=A)

    out = pl.pallas_call(
        kernel,
        out_shape=jax.ShapeDtypeStruct((B_pad, A), jnp.float32),
        grid=(grid_n,),
        in_specs=[
            pl.BlockSpec((tb, S), lambda i: (i, 0)),         # unpadded f32 activations
            pl.BlockSpec((S, H_pad), lambda i: (0, 0)),      # weights stay VMEM-resident
            pl.BlockSpec((1, H_pad), lambda i: (0, 0)),
            pl.BlockSpec((H_pad, A_pad), lambda i: (0, 0)),
            pl.BlockSpec((1, A_pad), lambda i: (0, 0)),
        ],
        out_specs=pl.BlockSpec((tb, A), lambda i: (i, 0)),   # unpadded action dim
        compiler_params=pltpu.CompilerParams(dimension_semantics=("parallel",)),
    )(x, w1_p, b1_p, w2_p, b2_p)

    return out if B_pad == B else out[:B]


def init_params(key, state_dim, hidden_s, action_dim):
    """Mimics the torch init: fc1 weight ~ fanin_init (uniform +-1/sqrt(fan_in)), fc1 bias
    torch default; fc2 weight uniform +-DDPG_EPS, fc2 bias torch default. Stored (in, out)."""
    k1w, k1b, k2w, k2b = jax.random.split(key, 4)
    bound1 = 1.0 / float(state_dim) ** 0.5
    bound2 = 1.0 / float(hidden_s) ** 0.5
    return {
        "w1": jax.random.uniform(k1w, (state_dim, hidden_s), jnp.float32, -bound1, bound1),
        "b1": jax.random.uniform(k1b, (1, hidden_s), jnp.float32, -bound1, bound1),
        "w2": jax.random.uniform(k2w, (hidden_s, action_dim), jnp.float32, -DDPG_EPS, DDPG_EPS),
        "b2": jax.random.uniform(k2b, (1, action_dim), jnp.float32, -bound2, bound2),
    }


def _reference(state, p, action_lim):
    h = jnp.maximum(state @ p["w1"] + p["b1"], 0.0)
    return jnp.tanh(h @ p["w2"] + p["b2"]) * action_lim


if __name__ == "__main__":
    B, state_dim, hidden_s, action_dim = 2, 16, 32, 4
    action_lim = 2.0

    key = jax.random.PRNGKey(0)
    key, kx = jax.random.split(key)
    state = jax.random.normal(kx, (B, state_dim), jnp.float32)
    params = init_params(key, state_dim, hidden_s, action_dim)
    prepped = prepare_params(params)          # one-time weight pad + bf16 cast

    # Small-batch path: single full-extent tile, no padding of state, no output slice.
    out = jax.block_until_ready(actor_ddpg_forward(state, prepped, action_lim))
    expected = _reference(state, params, action_lim)
    assert out.shape == (B, action_dim)
    # bf16 matmul operands -> slightly looser agreement with the f32 reference.
    assert jnp.allclose(out, expected, atol=2e-3, rtol=2e-2)

    # Larger batch with a small batch_tile to exercise the balanced multi-tile grid
    # (grid=(3,), tb=104, batch padded 300 -> 312) and the post-slice path.
    key, kx2 = jax.random.split(key)
    state_big = jax.random.normal(kx2, (300, state_dim), jnp.float32)
    out_big = jax.block_until_ready(
        actor_ddpg_forward(state_big, prepped, action_lim, batch_tile=128))
    expected_big = _reference(state_big, params, action_lim)
    assert out_big.shape == (300, action_dim)
    assert jnp.allclose(out_big, expected_big, atol=2e-3, rtol=2e-2)

    print("KERNEL_OK")
</pallas_src>

<mosaic_0001>
module attributes {stable_mosaic.version = 11 : i64} {
  func.func @actor_kernel(%arg0: i32, %arg1: memref<2x16xf32, #tpu.memory_space<vmem>>, %arg2: memref<16x128xbf16, #tpu.memory_space<vmem>>, %arg3: memref<1x128xf32, #tpu.memory_space<vmem>>, %arg4: memref<128x128xbf16, #tpu.memory_space<vmem>>, %arg5: memref<1x128xf32, #tpu.memory_space<vmem>>, %arg6: memref<2x4xf32, #tpu.memory_space<vmem>>) attributes {dimension_semantics = [#tpu.dimension_semantics<parallel>], iteration_bounds = array<i64: 1>, scalar_prefetch = 0 : i64, scratch_operands = 0 : i64, tpu.core_type = #tpu.core_type<tc>, window_params = [{transform_indices = @transform_0, window_bounds = array<i64: 2, 16>}, {pipeline_mode = #tpu.pipeline_mode<synchronous>, transform_indices = @transform_1, window_bounds = array<i64: 16, 128>}, {pipeline_mode = #tpu.pipeline_mode<synchronous>, transform_indices = @transform_2, window_bounds = array<i64: 1, 128>}, {pipeline_mode = #tpu.pipeline_mode<synchronous>, transform_indices = @transform_3, window_bounds = array<i64: 128, 128>}, {pipeline_mode = #tpu.pipeline_mode<synchronous>, transform_indices = @transform_4, window_bounds = array<i64: 1, 128>}, {transform_indices = @transform_5, window_bounds = array<i64: 2, 4>}]} {
    %c0 = arith.constant 0 : index
    %c0_0 = arith.constant 0 : index
    %0 = vector.load %arg1[%c0, %c0_0] : memref<2x16xf32, #tpu.memory_space<vmem>>, vector<2x16xf32>
    %1 = arith.truncf %0 : vector<2x16xf32> to vector<2x16xbf16>
    %c0_1 = arith.constant 0 : index
    %c0_2 = arith.constant 0 : index
    %2 = vector.load %arg2[%c0_1, %c0_2] : memref<16x128xbf16, #tpu.memory_space<vmem>>, vector<16x128xbf16>
    %cst = arith.constant dense<0.000000e+00> : vector<2x128xf32>
    %3 = tpu.matmul %1, %2, %cst {dimension_numbers = #tpu.dot_dimension_numbers<[1], [0], [0], [1], [0, 0, 1, 1], [], []>} : vector<2x16xbf16>, vector<16x128xbf16>, vector<2x128xf32> -> vector<2x128xf32>
    %c0_3 = arith.constant 0 : index
    %c0_4 = arith.constant 0 : index
    %4 = vector.load %arg3[%c0_3, %c0_4] : memref<1x128xf32, #tpu.memory_space<vmem>>, vector<1x128xf32>
    %5 = vector.broadcast %4 : vector<1x128xf32> to vector<2x128xf32>
    %6 = arith.addf %3, %5 : vector<2x128xf32>
    %cst_5 = arith.constant 0.000000e+00 : f32
    %7 = vector.broadcast %cst_5 : f32 to vector<2x128xf32>
    %8 = arith.maximumf %6, %7 : vector<2x128xf32>
    %9 = arith.truncf %8 : vector<2x128xf32> to vector<2x128xbf16>
    %c0_6 = arith.constant 0 : index
    %c0_7 = arith.constant 0 : index
    %10 = vector.load %arg4[%c0_6, %c0_7] : memref<128x128xbf16, #tpu.memory_space<vmem>>, vector<128x128xbf16>
    %cst_8 = arith.constant dense<0.000000e+00> : vector<2x128xf32>
    %11 = tpu.matmul %9, %10, %cst_8 {dimension_numbers = #tpu.dot_dimension_numbers<[1], [0], [0], [1], [0, 0, 1, 1], [], []>} : vector<2x128xbf16>, vector<128x128xbf16>, vector<2x128xf32> -> vector<2x128xf32>
    %c0_9 = arith.constant 0 : index
    %c0_10 = arith.constant 0 : index
    %12 = vector.load %arg5[%c0_9, %c0_10] : memref<1x128xf32, #tpu.memory_space<vmem>>, vector<1x128xf32>
    %13 = vector.broadcast %12 : vector<1x128xf32> to vector<2x128xf32>
    %14 = arith.addf %11, %13 : vector<2x128xf32>
    %15 = math.tanh %14 : vector<2x128xf32>
    %cst_11 = arith.constant 2.000000e+00 : f32
    %16 = vector.broadcast %cst_11 : f32 to vector<2x128xf32>
    %17 = arith.mulf %15, %16 : vector<2x128xf32>
    %18 = vector.extract_strided_slice %17 {offsets = [0, 0], sizes = [2, 4], strides = [1, 1]} : vector<2x128xf32> to vector<2x4xf32>
    %c0_12 = arith.constant 0 : index
    %c0_13 = arith.constant 0 : index
    %19 = vector.load %arg6[%c0_12, %c0_13] : memref<2x4xf32, #tpu.memory_space<vmem>>, vector<2x4xf32>
    tpu.vector_store %arg6[%c0_12, %c0_13], %18 {strides = array<i32>} : memref<2x4xf32, #tpu.memory_space<vmem>>, vector<2x4xf32>,
    return
  }
  func.func @transform_0(%arg0: i32) -> (i32, i32) {
    %c0_i32 = arith.constant 0 : i32
    %c0_i32_0 = arith.constant 0 : i32
    return %arg0, %c0_i32 : i32, i32
  }
  func.func @transform_1(%arg0: i32) -> (i32, i32) {
    %c0_i32 = arith.constant 0 : i32
    %c0_i32_0 = arith.constant 0 : i32
    %c0_i32_1 = arith.constant 0 : i32
    return %c0_i32, %c0_i32_0 : i32, i32
  }
  func.func @transform_2(%arg0: i32) -> (i32, i32) {
    %c0_i32 = arith.constant 0 : i32
    %c0_i32_0 = arith.constant 0 : i32
    %c0_i32_1 = arith.constant 0 : i32
    return %c0_i32, %c0_i32_0 : i32, i32
  }
  func.func @transform_3(%arg0: i32) -> (i32, i32) {
    %c0_i32 = arith.constant 0 : i32
    %c0_i32_0 = arith.constant 0 : i32
    %c0_i32_1 = arith.constant 0 : i32
    return %c0_i32, %c0_i32_0 : i32, i32
  }
  func.func @transform_4(%arg0: i32) -> (i32, i32) {
    %c0_i32 = arith.constant 0 : i32
    %c0_i32_0 = arith.constant 0 : i32
    %c0_i32_1 = arith.constant 0 : i32
    return %c0_i32, %c0_i32_0 : i32, i32
  }
  func.func @transform_5(%arg0: i32) -> (i32, i32) {
    %c0_i32 = arith.constant 0 : i32
    %c0_i32_0 = arith.constant 0 : i32
    return %arg0, %c0_i32 : i32, i32
  }
}

</mosaic_0001>

<bundles_post_ra>
// kernel: tpu_custom_call.1
= control target key start
LH: loop header
LB: loop body
LE: loop exit
PB: predicated region body
PF: predicated region fallthrough
CT: control target
= control target key end

     0   :  { %10 = vsyncpa [#allocation3], 0  ;;  %s465_s0 = inlined_call_operand.hbm [shape: f32[2,16], index: 0, kind: input, shape index: {}]   ;;  %s466_s1 = inlined_call_operand.hbm [shape: bf16[16,128], index: 1, kind: input, shape index: {}]   ;;  %s467_s2 = inlined_call_operand.vmem [shape: f32[1,128], index: 2, kind: input, shape index: {}]   ;;  %s468_s3 = inlined_call_operand.hbm [shape: bf16[128,128], index: 3, kind: input, shape index: {}]   ;;  %s469_s4 = inlined_call_operand.vmem [shape: f32[1,128], index: 4, kind: input, shape index: {}]   ;;  %s470_s5 = inlined_call_operand.hbm [shape: f32[2,4], index: 5, kind: output, shape index: {}]  }
   0x1   :  { %11 = vsyncpa [#allocation6], 0 }
   0x2   :  { %12 = vsyncpa [#allocation4], 0  ;;  %s409_s18 = smov [#allocation5]  }
   0x3   :  { %s28_s19 = sshll.u32 %s409_s18, 4  ;;  %s29_s19 = int_to_ptr.vmem [resolvable:$true] %s28_s19 }
   0x4   :  { %s331_s20 = scalar_lea.vmem %s29_s19, 128  ;;  %p336_p1 = scmp.lt.s32.totalorder %s29_s19, %s29_s19 }
   0x5   :  { %p332_p0 = scmp.ne.s32.totalorder %s29_s19, %s331_s20  ;;  %p337_p2 = scmp.lt.s32.totalorder %s331_s20, %s331_s20 }
   0x7   :  { %p338_p3 = por %p337_p2, %p336_p1 }
   0x9   :  { %p339_p4 = pnand %p338_p3, %p332_p0 }
   0xb   :  { %342 = shalt.err (!%p339_p4)
}
   0xc   :  { %s410_s21 = smov 64   ;;  %s411_s22 = smov 4  }
   0xd   :  { %34 = dma.hbm_to_vmem [thread:$0]  %s466_s1, 128, %s29_s19, [#allocation6], %s410_s21, %s410_s21, %s411_s22  }
   0xe   :  { %s412_s25 = smov [#allocation2]   ;;  %s413_s27 = smov [#allocation7]  }
   0xf   :  { %s19_s26 = sshll.u32 %s412_s25, 4  ;;  %s42_s28 = sshll.u32 %s413_s27, 4  ;;  %s20_s26 = int_to_ptr.vmem [resolvable:$true] %s19_s26  ;;  %s43_s28 = int_to_ptr.vmem [resolvable:$true] %s42_s28 }
  0x10   :  { %s351_s29 = scalar_lea.vmem %s20_s26, 32  ;;  %p356_p6 = scmp.lt.s32.totalorder %s20_s26, %s20_s26 }
  0x11   :  { %p352_p5 = scmp.ne.s32.totalorder %s20_s26, %s351_s29  ;;  %p357_p7 = scmp.lt.s32.totalorder %s351_s29, %s351_s29 }
  0x13   :  { %p358_p8 = por %p357_p7, %p356_p6 }
  0x15   :  { %p359_p9 = pnand %p358_p8, %p352_p5 }
  0x17   :  { %362 = shalt.err (!%p359_p9)
}
  0x18   :  { %22 = dma.hbm_to_vmem [thread:$0]  %s465_s0, 32, %s20_s26, [#allocation3]  }
  0x19   :  { %s371_s7 = scalar_lea.vmem %s43_s28, 1024  ;;  %p376_p11 = scmp.lt.s32.totalorder %s43_s28, %s43_s28 }
  0x1a   :  { %p372_p10 = scmp.ne.s32.totalorder %s43_s28, %s371_s7  ;;  %p377_p12 = scmp.lt.s32.totalorder %s371_s7, %s371_s7 }
  0x1c   :  { %p378_p13 = por %p377_p12, %p376_p11 }
  0x1e   :  { %p379_p0 = pnand %p378_p13, %p372_p10 }
  0x20   :  { %382 = shalt.err (!%p379_p0)
}
  0x21   :  { %48 = dma.hbm_to_vmem [thread:$0]  %s468_s3, 1024, %s43_s28, [#allocation6], %s410_s21, %s410_s21, %s411_s22  }
  0x22   :  { %403 = dma.done.wait [#allocation3], 32  }
  0x23   :  { %404 = vsyncadd [#allocation3], 4294967264 }
  0x24   :  { %405 = dma.done.wait [#allocation6], 1152  }
  0x25   :  { %406 = vsyncadd [#allocation6], 4294966144  ;;  %v414_v0 = vmov 0.0   ;;  %vm415_vm0 = vmmov 0   ;;  %v312_v1 = vld [vmem:[#allocation5] sm:$0xff]   ;;  %vm78_vm1 = vcmask 130048  }
  0x26   :  { %278 = vmatprep.subr.bf16.mxu0 %v414_v0  ;;  %280 = vmatprep.mubr.msk.bf16.mxu0 %vm415_vm0, %v414_v0  ;;  %v61_v2 = vld [vmem:[#allocation2] sm:$0x3]  ;;  %v313_v4 = vld [vmem:[#allocation7 + $0x38] sm:$0xff]   ;;  %v315_v6 = vld [vmem:[#allocation7 + $0x28] sm:$0xff]   ;;  %s416_s11 = smov [#allocation8]   ;;  %vm237_vm2 = vcmask 25600  }
  0x27   :  { %284 = vmatprep.subr.bf16.mxu1 %v414_v0  ;;  %300 = vmatprep.mubr.msk.bf16.mxu1 %vm415_vm0, %v414_v0  ;;  %v62_v3 = vpack.c.bf16 %v61_v2, %v61_v2  ;;  %v314_v5 = vld [vmem:[#allocation7 + $0x30] sm:$0xff]   ;;  %v316_v7 = vld [vmem:[#allocation7 + $0x20] sm:$0xff]   ;;  %v317_v8 = vld [vmem:[#allocation7 + $0x18] sm:$0xff]  }
  0x28   :  { %279 = vmatpush3.bf16.msra.mxu0 %v312_v1  ;;  %285 = vmatpush3.bf16.msra.mxu1 %v313_v4  ;;  %v318_v9 = vld [vmem:[#allocation7 + $0x10] sm:$0xff]   ;;  %v319_v10 = vld [vmem:[#allocation7 + $0x8] sm:$0xff]   ;;  %v320_v11 = vld [vmem:[#allocation7] sm:$0xff]  }
  0x29   :  { %286 = vmatprep.subr.bf16.mxu1 %v414_v0  ;;  %v255_v12 = vld [vmem:[%s467_s2] ss:$0 sm:$0xff]  ;;  %s245_s2 = sshll.u32 %s416_s11, 4  ;;  %s246_s2 = int_to_ptr.vmem [resolvable:$true] %s245_s2 }
  0x2a   :  { %v258_v20 = vld [vmem:[%s469_s4] ss:$0 sm:$0xff]  ;;  %s383_s12 = scalar_lea.vmem %s246_s2, 32  ;;  %p388_p2 = scmp.lt.s32.totalorder %s246_s2, %s246_s2 }
  0x2b   :  { %281 = vmatmul.mubr.msk.bf16.vlgmr.msra.gmra.mxu0 %vm78_vm1, %v62_v3  ;;  %p384_p1 = scmp.ne.s32.totalorder %s246_s2, %s383_s12  ;;  %p389_p3 = scmp.lt.s32.totalorder %s383_s12, %s383_s12 }
  0x2c   :  { %287 = vmatpush3.bf16.msra.mxu1 %v314_v5 }
  0x2d   :  { %288 = vmatprep.subr.bf16.mxu1 %v414_v0  ;;  %p390_p4 = por %p389_p3, %p388_p2 }
  0x2f   :  { %p391_p5 = pnand %p390_p4, %p384_p1 }
  0x30   :  { %289 = vmatpush3.bf16.msra.mxu1 %v315_v6 }
  0x31   :  { %290 = vmatprep.subr.bf16.mxu1 %v414_v0 }
  0x34   :  { %291 = vmatpush3.bf16.msra.mxu1 %v316_v7 }
  0x35   :  { %292 = vmatprep.subr.bf16.mxu1 %v414_v0 }
  0x38   :  { %293 = vmatpush3.bf16.msra.mxu1 %v317_v8 }
  0x39   :  { %294 = vmatprep.subr.bf16.mxu1 %v414_v0 }
  0x3c   :  { %295 = vmatpush3.bf16.msra.mxu1 %v318_v9 }
  0x3d   :  { %296 = vmatprep.subr.bf16.mxu1 %v414_v0 }
  0x40   :  { %297 = vmatpush3.bf16.msra.mxu1 %v319_v10 }
  0x41   :  { %298 = vmatprep.subr.bf16.mxu1 %v414_v0 }
  0x44   :  { %299 = vmatpush3.bf16.msra.mxu1 %v320_v11 }
  0xeb   :  { %v116_v13 = vpop.f32.mrf.mxu0 }
  0xec   :  { %v117_v14 = vadd.f32 %v255_v12, %v116_v13 }
  0xed   :  { %v282_v15 = vpop.f32.mrf.mxu0 }
  0xee   :  { %v122_v16 = vmax.f32 %v117_v14, 0.0 }
  0xef   :  { %v119_v17 = vpop.f32.mrf.mxu0 }
  0xf0   :  { %v123_v18 = vpack.c.bf16 %v122_v16, %v122_v16 }
  0xf1   :  { %v283_v19 = vpop.f32.mrf.mxu0 }
  0xf2   :  { %301 = vmatmul.mubr.bf16.vlgmr.msra.gmra.mxu1 %v123_v18 }
 0x1b2   :  { %v229_v21 = vpop.f32.mrf.mxu1 }
 0x1b3   :  { %v230_v22 = vadd.f32 %v258_v20, %v229_v21 }
 0x1b4   :  { %v302_v23 = vpop.f32.mrf.mxu1 }
 0x1b5   :  { %321 = vtanh.f32 %v230_v22 }
 0x1b6   :  { %v232_v24 = vpop.f32.mrf.mxu1 }
 0x1b8   :  { %v303_v25 = vpop.f32.mrf.mxu1 }
 0x1c2   :  { %v322_v26 = vpop.eup %321 }
 0x1c3   :  { %v236_v27 = vmul.f32 2.0, %v322_v26 }
 0x1c5   :  { %238 = vst.msk [vmem:[#allocation8] sm:$0x3] %vm237_vm2, %v236_v27 }
 0x1c6   :  { %394 = shalt.err (!%p391_p5)
}
 0x1c7   :  { %248 = dma.vmem_to_hbm [thread:$0]  %s246_s2, 32, %s470_s5, [#allocation4]  }
 0x1c8   :  { %407 = dma.done.wait [#allocation4], 32  }
 0x1c9   :  { %408 = vsyncadd [#allocation4], 4294967264 }
 0x1ca   :  { %252 = vsyncpa [#allocation3], 1 }
 0x1cb   :  { %253 = vsyncpa [#allocation6], 1 }
 0x1cc   :  { %254 = vsyncpa [#allocation4], 1 }

</bundles_post_ra>
